<compile_context>
chip_gen: v7x
topology: tpu7x:2x2x1
jax: 0.10.0
libtpu: 0.0.40
codegen_flags: <defaults>
</compile_context>

<pallas_src>
import math
from typing import Optional, Tuple, Dict, Any

import jax
import jax.numpy as jnp
from jax.experimental import pallas as pl
from jax.experimental.pallas import tpu as pltpu

_LANE = 128           # TPU lane width — keep the output lane-dense.
_TARGET_ROWS = 1024   # ~1024x128 tiles: measured ~86% of HBM roofline for copies.
_MIN_ROWS = 32        # divisible by the sublane-packing of f32/bf16/int8 alike.


def _identity_copy_kernel(k_ref, v_ref, ck_ref, cv_ref):
    # Pure pass-through: compressed_keys = keys, compressed_values = values.
    ck_ref[...] = k_ref[...]
    cv_ref[...] = v_ref[...]


def _pack_lane_dense(x: jax.Array, tile_rows: int, padded_rows: int) -> jax.Array:
    """Flatten to 1-D, zero-pad, and reshape to a lane-dense [padded_rows, 128] slab."""
    total = math.prod(x.shape)
    flat = x.reshape(-1)
    pad = padded_rows * _LANE - total
    if pad:
        flat = jnp.pad(flat, (0, pad))
    return flat.reshape(padded_rows, _LANE)


@jax.jit
def _materialized_identity(keys: jax.Array, values: jax.Array):
    """Materialize fresh output buffers via a tiled, lane-dense Pallas copy."""
    orig_shape = keys.shape
    total = math.prod(orig_shape)

    nrows = pl.cdiv(total, _LANE)
    if nrows < _TARGET_ROWS:
        tile_rows = max(_MIN_ROWS, pl.next_power_of_2(nrows))
    else:
        tile_rows = _TARGET_ROWS
    padded_rows = pl.cdiv(nrows, tile_rows) * tile_rows
    grid = (padded_rows // tile_rows,)

    kf = _pack_lane_dense(keys, tile_rows, padded_rows)
    vf = _pack_lane_dense(values, tile_rows, padded_rows)

    spec = pl.BlockSpec((tile_rows, _LANE), lambda i: (i, 0))

    bytes_accessed = 2 * padded_rows * _LANE * (
        jnp.dtype(keys.dtype).itemsize + jnp.dtype(values.dtype).itemsize)

    ckf, cvf = pl.pallas_call(
        _identity_copy_kernel,
        out_shape=(
            jax.ShapeDtypeStruct(kf.shape, kf.dtype),
            jax.ShapeDtypeStruct(vf.shape, vf.dtype),
        ),
        grid_spec=pltpu.PrefetchScalarGridSpec(
            num_scalar_prefetch=0,
            grid=grid,
            in_specs=[spec, spec],
            out_specs=[spec, spec],
        ),
        # Let XLA alias (and ideally elide) the HBM round trip for this identity.
        input_output_aliases={0: 0, 1: 1},
        compiler_params=pltpu.CompilerParams(
            dimension_semantics=("parallel",),
            vmem_limit_bytes=32 * 1024 * 1024,
        ),
        cost_estimate=pl.CostEstimate(
            flops=0, transcendentals=0, bytes_accessed=int(bytes_accessed)),
    )(kf, vf)

    ck = ckf.reshape(-1)[:total].reshape(orig_shape)
    cv = cvf.reshape(-1)[:total].reshape(orig_shape)
    return ck, cv


def base_compressor_forward(
    keys: jax.Array,
    values: jax.Array,
    importance: Optional[jax.Array] = None,
    *,
    materialize: bool = False,
) -> Tuple[jax.Array, jax.Array]:
    """Pallas implementation of BaseCompressor.forward.

    Args:
      keys:   [batch, seq_len, hidden_size]
      values: [batch, seq_len, hidden_size]
      importance: ignored (the base compressor does not use it)
      materialize: if False (default), return the inputs directly — the identity
        is free and no HBM traffic is spent. If True, produce fresh output
        buffers through the lane-dense tiled Pallas copy kernel.

    Returns:
      (compressed_keys, compressed_values), identical to the inputs.
    """
    assert keys.shape == values.shape
    del importance  # unused by the base compressor
    if not materialize:
        # Top recommendation from the perf review: the identity needs zero bytes moved.
        return keys, values
    return _materialized_identity(keys, values)


def get_compression_stats(hidden_size: int) -> Dict[str, Any]:
    return {"hidden_size": hidden_size}


if __name__ == "__main__":
    # Small shapes consistent with the module: [batch, seq, hidden]
    B, S, H = 2, 8, 32
    key = jax.random.PRNGKey(0)
    k1, k2, k3 = jax.random.split(key, 3)

    keys = jax.random.normal(k1, (B, S, H), dtype=jnp.float32)
    values = jax.random.normal(k2, (B, S, H), dtype=jnp.float32)
    importance = jax.random.uniform(k3, (B, S), dtype=jnp.float32)  # unused by base

    # Default zero-copy path (preferred for production).
    ck0, cv0 = base_compressor_forward(keys, values, importance)

    # Materialized Pallas path (exercises the kernel).
    ck, cv = base_compressor_forward(keys, values, importance, materialize=True)
    jax.block_until_ready((ck0, cv0, ck, cv))

    # Verify exact identity semantics on both paths.
    assert ck0.shape == keys.shape and cv0.shape == values.shape
    assert ck.shape == keys.shape and cv.shape == values.shape
    assert ck.dtype == keys.dtype and cv.dtype == values.dtype
    assert bool(jnp.array_equal(ck0, keys)) and bool(jnp.array_equal(cv0, values))
    assert bool(jnp.array_equal(ck, keys)) and bool(jnp.array_equal(cv, values))

    print("KERNEL_OK")
</pallas_src>

<mosaic_0001>
module attributes {stable_mosaic.version = 11 : i64} {
  func.func @_identity_copy_kernel(%arg0: i32, %arg1: memref<32x128xf32, #tpu.memory_space<vmem>>, %arg2: memref<32x128xf32, #tpu.memory_space<vmem>>, %arg3: memref<32x128xf32, #tpu.memory_space<vmem>>, %arg4: memref<32x128xf32, #tpu.memory_space<vmem>>) attributes {dimension_semantics = [#tpu.dimension_semantics<parallel>], iteration_bounds = array<i64: 1>, scalar_prefetch = 0 : i64, scratch_operands = 0 : i64, tpu.core_type = #tpu.core_type<tc>, window_params = [{transform_indices = @transform_0, window_bounds = array<i64: 32, 128>}, {transform_indices = @transform_1, window_bounds = array<i64: 32, 128>}, {transform_indices = @transform_2, window_bounds = array<i64: 32, 128>}, {transform_indices = @transform_3, window_bounds = array<i64: 32, 128>}]} {
    %c0 = arith.constant 0 : index
    %c0_0 = arith.constant 0 : index
    %0 = vector.load %arg1[%c0, %c0_0] : memref<32x128xf32, #tpu.memory_space<vmem>>, vector<32x128xf32>
    %c0_1 = arith.constant 0 : index
    %c0_2 = arith.constant 0 : index
    %1 = vector.load %arg3[%c0_1, %c0_2] : memref<32x128xf32, #tpu.memory_space<vmem>>, vector<32x128xf32>
    tpu.vector_store %arg3[%c0_1, %c0_2], %0 {strides = array<i32>} : memref<32x128xf32, #tpu.memory_space<vmem>>, vector<32x128xf32>,
    %c0_3 = arith.constant 0 : index
    %c0_4 = arith.constant 0 : index
    %2 = vector.load %arg2[%c0_3, %c0_4] : memref<32x128xf32, #tpu.memory_space<vmem>>, vector<32x128xf32>
    %c0_5 = arith.constant 0 : index
    %c0_6 = arith.constant 0 : index
    %3 = vector.load %arg4[%c0_5, %c0_6] : memref<32x128xf32, #tpu.memory_space<vmem>>, vector<32x128xf32>
    tpu.vector_store %arg4[%c0_5, %c0_6], %2 {strides = array<i32>} : memref<32x128xf32, #tpu.memory_space<vmem>>, vector<32x128xf32>,
    return
  }
  func.func @transform_0(%arg0: i32) -> (i32, i32) {
    %c0_i32 = arith.constant 0 : i32
    %c0_i32_0 = arith.constant 0 : i32
    return %arg0, %c0_i32 : i32, i32
  }
  func.func @transform_1(%arg0: i32) -> (i32, i32) {
    %c0_i32 = arith.constant 0 : i32
    %c0_i32_0 = arith.constant 0 : i32
    return %arg0, %c0_i32 : i32, i32
  }
  func.func @transform_2(%arg0: i32) -> (i32, i32) {
    %c0_i32 = arith.constant 0 : i32
    %c0_i32_0 = arith.constant 0 : i32
    return %arg0, %c0_i32 : i32, i32
  }
  func.func @transform_3(%arg0: i32) -> (i32, i32) {
    %c0_i32 = arith.constant 0 : i32
    %c0_i32_0 = arith.constant 0 : i32
    return %arg0, %c0_i32 : i32, i32
  }
}

</mosaic_0001>

<bundles_post_ra>
// kernel: _materialized_identity.1
= control target key start
LH: loop header
LB: loop body
LE: loop exit
PB: predicated region body
PF: predicated region fallthrough
CT: control target
= control target key end

     0   :  { %s105_s0 = inlined_call_operand.vmem [shape: f32[32,128], index: 0, kind: input, shape index: {}, may-alias: {0,2}]   ;;  %s106_s2 = inlined_call_operand.vmem [shape: f32[32,128], index: 2, kind: output, shape index: {0}, may-alias: {0,2}]   ;;  %s107_s1 = inlined_call_operand.vmem [shape: f32[32,128], index: 1, kind: input, shape index: {}, may-alias: {1,3}]   ;;  %s108_s3 = inlined_call_operand.vmem [shape: f32[32,128], index: 3, kind: output, shape index: {1}, may-alias: {1,3}]  }
   0x1   :  { %v13_v0 = vld [vmem:[%s105_s0] sm:$0xff]  ;;  %v14_v1 = vld [vmem:[%s105_s0 + $0x8] sm:$0xff]  ;;  %v15_v2 = vld [vmem:[%s105_s0 + $0x10] sm:$0xff] }
   0x2   :  { %17 = vst [vmem:[%s106_s2] sm:$0xff] %v13_v0  ;;  %18 = vst [vmem:[%s106_s2 + $0x8] sm:$0xff] %v14_v1  ;;  %v21_v4 = vld [vmem:[%s107_s1] sm:$0xff]  ;;  %v22_v5 = vld [vmem:[%s107_s1 + $0x8] sm:$0xff] }
   0x3   :  { %19 = vst [vmem:[%s106_s2 + $0x10] sm:$0xff] %v15_v2  ;;  %25 = vst [vmem:[%s108_s3] sm:$0xff] %v21_v4 }
   0x4   :  { %26 = vst [vmem:[%s108_s3 + $0x8] sm:$0xff] %v22_v5 }
   0xa   :  { %v16_v3 = vld [vmem:[%s105_s0 + $0x18] sm:$0xff] }
   0xb   :  { %20 = vst [vmem:[%s106_s2 + $0x18] sm:$0xff] %v16_v3  ;;  %v23_v6 = vld [vmem:[%s107_s1 + $0x10] sm:$0xff]  ;;  %v24_v7 = vld [vmem:[%s107_s1 + $0x18] sm:$0xff] }
   0xc   :  { %27 = vst [vmem:[%s108_s3 + $0x10] sm:$0xff] %v23_v6  ;;  %28 = vst [vmem:[%s108_s3 + $0x18] sm:$0xff] %v24_v7 }

</bundles_post_ra>
